<compile_context>
chip_gen: v6e
topology: v6e:2x2x1
jax: 0.10.0
libtpu: 0.0.40
codegen_flags: <defaults>
</compile_context>

<pallas_src>
import jax
import jax.numpy as jnp
from jax.experimental import pallas as pl
from jax.experimental.pallas import tpu as pltpu

_LANE = 128      # vreg lane width / minimum MXU alignment
_SUBLANE = 8     # f32 vreg sublane count


def _round_up(n, m):
    return ((n + m - 1) // m) * m


def _cdiv(a, b):
    return (a + b - 1) // b


def mlp_kernel(x_ref, w1_ref, b1_ref, w2_ref, b2_ref, o_ref, acc_ref):
    """One (batch-tile, H-tile) step of fused fc1 -> ReLU -> fc2.

    Grid: (batch tiles [parallel], H tiles [arbitrary reduction]).
    acc_ref: f32 VMEM accumulator, resident across the H axis.
    """
    hk = pl.program_id(1)

    @pl.when(hk == 0)
    def _():
        acc_ref[...] = jnp.zeros_like(acc_ref)

    # Cast the activation tile to bf16 in-register (free VPU filler under the
    # MXU) instead of writing a padded bf16 copy of x to HBM.
    x = x_ref[...].astype(jnp.bfloat16)

    # fc1 partial: (TB, In) @ (In, Hk) -> f32 accumulate on the MXU.
    h = jnp.dot(x, w1_ref[...], preferred_element_type=jnp.float32)
    # Bias + ReLU epilogue in f32 on the VPU (keep f32: v5e has no bf16 VALU).
    h = jnp.maximum(h + b1_ref[...], 0.0)

    # fc2 partial over this H tile; accumulate in f32 across H tiles.
    acc_ref[...] += jnp.dot(h.astype(w2_ref.dtype), w2_ref[...],
                            preferred_element_type=jnp.float32)

    @pl.when(hk == pl.num_programs(1) - 1)
    def _():
        o_ref[...] = (acc_ref[...] + b2_ref[...]).astype(o_ref.dtype)


def _choose_batch_tile(B, max_tile=256):
    """Batch tile <= max_tile, multiple of the sublane, minimal padding waste,
    and >= 2 tiles once B is big enough to feed both v7x TensorCores."""
    n_tiles = _cdiv(B, max_tile)
    if n_tiles < 2 and B > max_tile // 2:
        n_tiles = 2
    return _round_up(_cdiv(B, n_tiles), _SUBLANE)


def _choose_h_tile(H, max_whole=1024):
    """Whole (128-aligned) H when small; otherwise a 512-wide tile
    (multiple of 256 to fill the 256-deep v6e/v7x MXU)."""
    h_lane = _round_up(H, _LANE)
    if h_lane <= max_whole:
        return h_lane
    return 512


@jax.jit
def neural_net_forward(x, w1, b1, w2, b2):
    """Fused fc1 -> ReLU -> fc2 (== PyTorch NeuralNet.forward).

    x: [B, In]; w1: [In, H]; b1: [1, H]; w2: [H, O]; b2: [1, O].
    Returns [B, O] in x.dtype.  bf16 MXU operands, f32 accumulation.
    """
    B, In = x.shape
    H = w1.shape[1]
    O = w2.shape[1]
    out_dtype = x.dtype
    out_itemsize = jnp.dtype(out_dtype).itemsize
    x_itemsize = jnp.dtype(x.dtype).itemsize

    TB = _choose_batch_tile(B)
    n_b = _cdiv(B, TB)
    B_p = n_b * TB

    Hk = _choose_h_tile(H)
    H_p = _round_up(H, Hk)
    n_h = H_p // Hk

    # 256-align O only when it is naturally large (fills the v6e/v7x MXU N
    # dim); otherwise lane-align so the output store is an unmasked vst.
    O_p = _round_up(O, 256 if O >= 256 else _LANE)

    # Zero padding is mathematically inert (relu(0 + 0) = 0, 0 @ w2 = 0) and
    # the padded rows/cols are sliced off below.  Everything here runs under
    # jit, so pads/casts fuse rather than dispatching separately.
    x_p = x if B_p == B else jnp.pad(x, ((0, B_p - B), (0, 0)))
    w1_p = jnp.pad(w1.astype(jnp.bfloat16), ((0, 0), (0, H_p - H)))
    w2_p = jnp.pad(w2.astype(jnp.bfloat16), ((0, H_p - H), (0, O_p - O)))
    b1_p = jnp.pad(b1.astype(jnp.float32), ((0, 0), (0, H_p - H)))
    b2_p = jnp.pad(b2.astype(jnp.float32), ((0, 0), (0, O_p - O)))

    grid = (n_b, n_h)

    # Advisory cost estimate so XLA schedules surrounding fused ops sensibly.
    flops = 2 * B_p * (In * H_p + H_p * O_p)
    bytes_accessed = (B_p * In * x_itemsize            # x read
                      + In * H_p * 2 + H_p * 4         # w1 + b1
                      + H_p * O_p * 2 + O_p * 4        # w2 + b2
                      + B_p * O_p * out_itemsize)      # output write
    cost = pl.CostEstimate(flops=flops, transcendentals=0,
                           bytes_accessed=bytes_accessed)

    # VMEM footprint of one pipelined step (double-buffered streamed operands
    # + resident f32 accumulator).  Raise the scoped limit only when needed;
    # cap below physical with headroom.
    vmem_est = (2 * TB * In * x_itemsize        # x tile
                + 2 * In * Hk * 2               # w1 tile
                + 2 * _SUBLANE * Hk * 4         # b1 tile (sublane-padded)
                + 2 * Hk * O_p * 2              # w2 tile
                + 2 * _SUBLANE * O_p * 4        # b2 tile
                + 2 * TB * O_p * out_itemsize   # output tile
                + TB * O_p * 4                  # accumulator scratch
                + 2 * TB * Hk * 4)              # in-flight hidden tile
    vmem_limit = int(min(max(2 * vmem_est, 32 * (1 << 20)), 96 * (1 << 20)))

    out_p = pl.pallas_call(
        mlp_kernel,
        out_shape=jax.ShapeDtypeStruct((B_p, O_p), out_dtype),
        grid_spec=pltpu.PrefetchScalarGridSpec(
            num_scalar_prefetch=0,
            grid=grid,
            in_specs=[
                # Activations: tiled over batch; block index is constant over
                # the H axis, so the tile is DMA'd once per batch tile.
                pl.BlockSpec((TB, In), lambda i, k: (i, 0)),
                # fc1 weight / bias: streamed per H tile.
                pl.BlockSpec((In, Hk), lambda i, k: (0, k)),
                pl.BlockSpec((1, Hk), lambda i, k: (0, k)),
                # fc2 weight: streamed per H tile.
                pl.BlockSpec((Hk, O_p), lambda i, k: (k, 0)),
                # fc2 bias: constant index -> DMA'd once, VMEM-resident.
                pl.BlockSpec((1, O_p), lambda i, k: (0, 0)),
            ],
            out_specs=pl.BlockSpec((TB, O_p), lambda i, k: (i, 0)),
            scratch_shapes=[pltpu.VMEM((TB, O_p), jnp.float32)],
        ),
        compiler_params=pltpu.CompilerParams(
            # Batch tiles independent (shard across v7x TensorCores);
            # H axis is the reduction -> arbitrary.
            dimension_semantics=("parallel", "arbitrary"),
            vmem_limit_bytes=vmem_limit,
        ),
        cost_estimate=cost,
    )(x_p, w1_p, b1_p, w2_p, b2_p)

    return out_p[:B, :O]


def init_linear_params(key, in_features, out_features):
    """Deterministic init mimicking PyTorch nn.Linear defaults:
    weight, bias ~ U(-1/sqrt(in), 1/sqrt(in)).  Weight stored transposed
    ([in, out]) so the kernel computes x @ W + b (== PyTorch x @ W.T + b)."""
    kw, kb = jax.random.split(key)
    bound = 1.0 / jnp.sqrt(jnp.float32(in_features))
    w = jax.random.uniform(kw, (in_features, out_features), jnp.float32, -bound, bound)
    b = jax.random.uniform(kb, (1, out_features), jnp.float32, -bound, bound)
    return w, b


if __name__ == "__main__":
    # Small shapes consistent with the module's forward: Y_p is [batch, input_size].
    batch = 8
    input_size = 32
    hidden_size1 = 64
    output_size = 16

    key = jax.random.PRNGKey(0)
    k_x, k_fc1, k_fc2 = jax.random.split(key, 3)

    x = jax.random.normal(k_x, (batch, input_size), jnp.float32)
    w1, b1 = init_linear_params(k_fc1, input_size, hidden_size1)
    w2, b2 = init_linear_params(k_fc2, hidden_size1, output_size)

    out = neural_net_forward(x, w1, b1, w2, b2)
    jax.block_until_ready(out)

    # f32 reference in plain JAX (same math as the PyTorch module).
    ref = jnp.maximum(x @ w1 + b1, 0.0) @ w2 + b2
    assert out.shape == (batch, output_size)
    # bf16 MXU operands -> looser tolerance vs. the pure-f32 reference
    # (intentional; the PyTorch module is f32 end-to-end).
    max_err = float(jnp.max(jnp.abs(out - ref)))
    assert jnp.allclose(out, ref, atol=5e-2, rtol=5e-2), f"max abs err {max_err}"

    print("KERNEL_OK")
</pallas_src>

<mosaic_0001>
module attributes {stable_mosaic.version = 11 : i64} {
  func.func @mlp_kernel(%arg0: i32, %arg1: i32, %arg2: memref<8x32xf32, #tpu.memory_space<vmem>>, %arg3: memref<32x128xbf16, #tpu.memory_space<vmem>>, %arg4: memref<1x128xf32, #tpu.memory_space<vmem>>, %arg5: memref<128x128xbf16, #tpu.memory_space<vmem>>, %arg6: memref<1x128xf32, #tpu.memory_space<vmem>>, %arg7: memref<8x128xf32, #tpu.memory_space<vmem>>, %arg8: memref<8x128xf32, #tpu.memory_space<vmem>>) attributes {dimension_semantics = [#tpu.dimension_semantics<parallel>, #tpu.dimension_semantics<arbitrary>], iteration_bounds = array<i64: 1, 1>, scalar_prefetch = 0 : i64, scratch_operands = 1 : i64, tpu.core_type = #tpu.core_type<tc>, window_params = [{transform_indices = @transform_0, window_bounds = array<i64: 8, 32>}, {transform_indices = @transform_1, window_bounds = array<i64: 32, 128>}, {transform_indices = @transform_2, window_bounds = array<i64: 1, 128>}, {transform_indices = @transform_3, window_bounds = array<i64: 128, 128>}, {pipeline_mode = #tpu.pipeline_mode<synchronous>, transform_indices = @transform_4, window_bounds = array<i64: 1, 128>}, {transform_indices = @transform_5, window_bounds = array<i64: 8, 128>}]} {
    %c0_i32 = arith.constant 0 : i32
    %0 = arith.cmpi eq, %arg1, %c0_i32 : i32
    %1 = arith.extui %0 : i1 to i32
    %c0_i32_0 = arith.constant 0 : i32
    %2 = arith.cmpi ne, %1, %c0_i32_0 : i32
    scf.if %2 {
      %cst_16 = arith.constant 0.000000e+00 : f32
      %21 = vector.broadcast %cst_16 : f32 to vector<8x128xf32>
      %c0_17 = arith.constant 0 : index
      %c0_18 = arith.constant 0 : index
      %22 = vector.load %arg8[%c0_17, %c0_18] : memref<8x128xf32, #tpu.memory_space<vmem>>, vector<8x128xf32>
      tpu.vector_store %arg8[%c0_17, %c0_18], %21 {strides = array<i32>} : memref<8x128xf32, #tpu.memory_space<vmem>>, vector<8x128xf32>,
    } else {
    }
    %c0 = arith.constant 0 : index
    %c0_1 = arith.constant 0 : index
    %3 = vector.load %arg2[%c0, %c0_1] : memref<8x32xf32, #tpu.memory_space<vmem>>, vector<8x32xf32>
    %4 = arith.truncf %3 : vector<8x32xf32> to vector<8x32xbf16>
    %c0_2 = arith.constant 0 : index
    %c0_3 = arith.constant 0 : index
    %5 = vector.load %arg3[%c0_2, %c0_3] : memref<32x128xbf16, #tpu.memory_space<vmem>>, vector<32x128xbf16>
    %cst = arith.constant dense<0.000000e+00> : vector<8x128xf32>
    %6 = tpu.matmul %4, %5, %cst {dimension_numbers = #tpu.dot_dimension_numbers<[1], [0], [0], [1], [0, 0, 1, 1], [], []>} : vector<8x32xbf16>, vector<32x128xbf16>, vector<8x128xf32> -> vector<8x128xf32>
    %c0_4 = arith.constant 0 : index
    %c0_5 = arith.constant 0 : index
    %7 = vector.load %arg4[%c0_4, %c0_5] : memref<1x128xf32, #tpu.memory_space<vmem>>, vector<1x128xf32>
    %8 = vector.broadcast %7 : vector<1x128xf32> to vector<8x128xf32>
    %9 = arith.addf %6, %8 : vector<8x128xf32>
    %cst_6 = arith.constant 0.000000e+00 : f32
    %10 = vector.broadcast %cst_6 : f32 to vector<8x128xf32>
    %11 = arith.maximumf %9, %10 : vector<8x128xf32>
    %c0_7 = arith.constant 0 : index
    %c0_8 = arith.constant 0 : index
    %12 = vector.load %arg8[%c0_7, %c0_8] : memref<8x128xf32, #tpu.memory_space<vmem>>, vector<8x128xf32>
    %13 = arith.truncf %11 : vector<8x128xf32> to vector<8x128xbf16>
    %c0_9 = arith.constant 0 : index
    %c0_10 = arith.constant 0 : index
    %14 = vector.load %arg5[%c0_9, %c0_10] : memref<128x128xbf16, #tpu.memory_space<vmem>>, vector<128x128xbf16>
    %cst_11 = arith.constant dense<0.000000e+00> : vector<8x128xf32>
    %15 = tpu.matmul %13, %14, %cst_11 {dimension_numbers = #tpu.dot_dimension_numbers<[1], [0], [0], [1], [0, 0, 1, 1], [], []>} : vector<8x128xbf16>, vector<128x128xbf16>, vector<8x128xf32> -> vector<8x128xf32>
    %16 = arith.addf %12, %15 : vector<8x128xf32>
    %c0_12 = arith.constant 0 : index
    %c0_13 = arith.constant 0 : index
    %17 = vector.load %arg8[%c0_12, %c0_13] : memref<8x128xf32, #tpu.memory_space<vmem>>, vector<8x128xf32>
    tpu.vector_store %arg8[%c0_12, %c0_13], %16 {strides = array<i32>} : memref<8x128xf32, #tpu.memory_space<vmem>>, vector<8x128xf32>,
    %c0_i32_14 = arith.constant 0 : i32
    %18 = arith.cmpi eq, %arg1, %c0_i32_14 : i32
    %19 = arith.extui %18 : i1 to i32
    %c0_i32_15 = arith.constant 0 : i32
    %20 = arith.cmpi ne, %19, %c0_i32_15 : i32
    scf.if %20 {
      %c0_16 = arith.constant 0 : index
      %c0_17 = arith.constant 0 : index
      %21 = vector.load %arg8[%c0_16, %c0_17] : memref<8x128xf32, #tpu.memory_space<vmem>>, vector<8x128xf32>
      %c0_18 = arith.constant 0 : index
      %c0_19 = arith.constant 0 : index
      %22 = vector.load %arg6[%c0_18, %c0_19] : memref<1x128xf32, #tpu.memory_space<vmem>>, vector<1x128xf32>
      %23 = vector.broadcast %22 : vector<1x128xf32> to vector<8x128xf32>
      %24 = arith.addf %21, %23 : vector<8x128xf32>
      %c0_20 = arith.constant 0 : index
      %c0_21 = arith.constant 0 : index
      %25 = vector.load %arg7[%c0_20, %c0_21] : memref<8x128xf32, #tpu.memory_space<vmem>>, vector<8x128xf32>
      tpu.vector_store %arg7[%c0_20, %c0_21], %24 {strides = array<i32>} : memref<8x128xf32, #tpu.memory_space<vmem>>, vector<8x128xf32>,
    } else {
    }
    return
  }
  func.func @transform_0(%arg0: i32, %arg1: i32) -> (i32, i32) {
    %c0_i32 = arith.constant 0 : i32
    %c0_i32_0 = arith.constant 0 : i32
    return %arg0, %c0_i32 : i32, i32
  }
  func.func @transform_1(%arg0: i32, %arg1: i32) -> (i32, i32) {
    %c0_i32 = arith.constant 0 : i32
    %c0_i32_0 = arith.constant 0 : i32
    return %c0_i32, %arg1 : i32, i32
  }
  func.func @transform_2(%arg0: i32, %arg1: i32) -> (i32, i32) {
    %c0_i32 = arith.constant 0 : i32
    %c0_i32_0 = arith.constant 0 : i32
    return %c0_i32, %arg1 : i32, i32
  }
  func.func @transform_3(%arg0: i32, %arg1: i32) -> (i32, i32) {
    %c0_i32 = arith.constant 0 : i32
    %c0_i32_0 = arith.constant 0 : i32
    return %arg1, %c0_i32 : i32, i32
  }
  func.func @transform_4(%arg0: i32, %arg1: i32) -> (i32, i32) {
    %c0_i32 = arith.constant 0 : i32
    %c0_i32_0 = arith.constant 0 : i32
    %c0_i32_1 = arith.constant 0 : i32
    return %c0_i32, %c0_i32_0 : i32, i32
  }
  func.func @transform_5(%arg0: i32, %arg1: i32) -> (i32, i32) {
    %c0_i32 = arith.constant 0 : i32
    %c0_i32_0 = arith.constant 0 : i32
    return %arg0, %c0_i32 : i32, i32
  }
}

</mosaic_0001>

<bundles_post_ra>
// kernel: neural_net_forward.1
= control target key start
LH: loop header
LB: loop body
LE: loop exit
PB: predicated region body
PF: predicated region fallthrough
CT: control target
= control target key end

     0   :  { %v320_v1 = vmov 0.0   ;;  %vm321_vm0 = vmmov 0   ;;  %vm52_vm1 = vcmask 261120   ;;  %s395_s0 = inlined_call_operand.vmem [shape: f32[8,32], index: 0, kind: input, shape index: {}]   ;;  %s396_s1 = inlined_call_operand.vmem [shape: bf16[32,128], index: 1, kind: input, shape index: {}]   ;;  %s397_s2 = inlined_call_operand.vmem [shape: f32[1,128], index: 2, kind: input, shape index: {}]   ;;  %s398_s3 = inlined_call_operand.vmem [shape: bf16[128,128], index: 3, kind: input, shape index: {}]   ;;  %s399_s4 = inlined_call_operand.vmem [shape: f32[1,128], index: 4, kind: input, shape index: {}]   ;;  %s400_s5 = inlined_call_operand.hbm [shape: f32[8,128], index: 5, kind: output, shape index: {}]  }
   0x1   :  { %v288_v0 = vld [vmem:[%s396_s1 + $0x8] sm:$0xff]   ;;  %257 = vmatprep.subr.bf16.mxu0 %v320_v1  ;;  %v289_v2 = vld [vmem:[%s396_s1] sm:$0xff]   ;;  %265 = vmatprep.subr.bf16.mxu1 %v320_v1  ;;  %v290_v4 = vld [vmem:[%s398_s3 + $0x38] sm:$0xff]  }
   0x2   :  { %258 = vmatpush3.bf16.msra.mxu0 %v288_v0  ;;  %261 = vmatprep.mubr.msk.bf16.mxu0 %vm321_vm0, %v320_v1  ;;  %v27_v3 = vld [vmem:[%s395_s0] sm:$0xff]  ;;  %v291_v6 = vld [vmem:[%s398_s3 + $0x30] sm:$0xff]   ;;  %v292_v7 = vld [vmem:[%s398_s3 + $0x28] sm:$0xff]  }
   0x3   :  { %259 = vmatprep.subr.bf16.mxu0 %v320_v1  ;;  %281 = vmatprep.mubr.msk.bf16.mxu1 %vm321_vm0, %v320_v1  ;;  %v28_v5 = vpack.c.bf16 %v27_v3, %v27_v3 }
   0x4   :  { %266 = vmatpush3.bf16.msra.mxu1 %v290_v4 }
   0x5   :  { %267 = vmatprep.subr.bf16.mxu1 %v320_v1 }
   0x6   :  { %260 = vmatpush3.bf16.msra.mxu0 %v289_v2 }
   0x8   :  { %268 = vmatpush3.bf16.msra.mxu1 %v291_v6 }
   0x9   :  { %262 = vmatmul.mubr.msk.bf16.vlgmr.msra.gmra.mxu0 %vm52_vm1, %v28_v5  ;;  %269 = vmatprep.subr.bf16.mxu1 %v320_v1 }
   0xa   :  { %10 = vsyncpa [#allocation4], 0  ;;  %v293_v8 = vld [vmem:[%s398_s3 + $0x20] sm:$0xff]   ;;  %v294_v9 = vld [vmem:[%s398_s3 + $0x18] sm:$0xff]   ;;  %s322_s17 = smov [#allocation3]  }
   0xb   :  { %v295_v10 = vld [vmem:[%s398_s3 + $0x10] sm:$0xff]   ;;  %v296_v11 = vld [vmem:[%s398_s3 + $0x8] sm:$0xff]   ;;  %v297_v12 = vld [vmem:[%s398_s3] sm:$0xff]   ;;  %s224_s18 = sshll.u32 %s322_s17, 4  ;;  %s225_s18 = int_to_ptr.vmem [resolvable:$true] %s224_s18 }
   0xc   :  { %270 = vmatpush3.bf16.msra.mxu1 %v292_v7  ;;  %v232_v13 = vld [vmem:[%s397_s2] ss:$0 sm:$0xff]  ;;  %s298_s2 = scalar_lea.vmem %s225_s18, 128  ;;  %p303_p1 = scmp.lt.s32.totalorder %s225_s18, %s225_s18 }
   0xd   :  { %271 = vmatprep.subr.bf16.mxu1 %v320_v1  ;;  %v244_v21 = vld [vmem:[%s399_s4] ss:$0 sm:$0xff]  ;;  %p299_p0 = scmp.ne.s32.totalorder %s225_s18, %s298_s2  ;;  %p304_p2 = scmp.lt.s32.totalorder %s298_s2, %s298_s2 }
   0xf   :  { %p305_p3 = por %p304_p2, %p303_p1 }
  0x10   :  { %272 = vmatpush3.bf16.msra.mxu1 %v293_v8 }
  0x11   :  { %273 = vmatprep.subr.bf16.mxu1 %v320_v1  ;;  %p306_p4 = pnand %p305_p3, %p299_p0 }
  0x14   :  { %274 = vmatpush3.bf16.msra.mxu1 %v294_v9 }
  0x15   :  { %275 = vmatprep.subr.bf16.mxu1 %v320_v1 }
  0x18   :  { %276 = vmatpush3.bf16.msra.mxu1 %v295_v10 }
  0x19   :  { %277 = vmatprep.subr.bf16.mxu1 %v320_v1 }
  0x1c   :  { %278 = vmatpush3.bf16.msra.mxu1 %v296_v11 }
  0x1d   :  { %279 = vmatprep.subr.bf16.mxu1 %v320_v1 }
  0x20   :  { %280 = vmatpush3.bf16.msra.mxu1 %v297_v12 }
  0xc9   :  { %v90_v14 = vpop.f32.mrf.mxu0 }
  0xca   :  { %v91_v15 = vadd.f32 %v232_v13, %v90_v14 }
  0xcb   :  { %v263_v16 = vpop.f32.mrf.mxu0 }
  0xcc   :  { %v96_v17 = vmax.f32 %v91_v15, 0.0 }
  0xcd   :  { %v93_v18 = vpop.f32.mrf.mxu0 }
  0xce   :  { %v98_v19 = vpack.c.bf16 %v96_v17, %v96_v17 }
  0xcf   :  { %v264_v20 = vpop.f32.mrf.mxu0 }
  0xd0   :  { %282 = vmatmul.mubr.bf16.vlgmr.msra.gmra.mxu1 %v98_v19 }
 0x190   :  { %v197_v22 = vpop.f32.mrf.mxu1 }
 0x191   :  { %v216_v23 = vadd.f32 %v244_v21, %v197_v22 }
 0x192   :  { %v283_v24 = vpop.f32.mrf.mxu1 }
 0x193   :  { %217 = vst [vmem:[#allocation3] sm:$0xff] %v216_v23 }
 0x194   :  { %v200_v25 = vpop.f32.mrf.mxu1 }
 0x195   :  { %309 = shalt.err (!%p306_p4)
}
 0x196   :  { %227 = dma.vmem_to_hbm [thread:$0]  %s225_s18, 128, %s400_s5, [#allocation4]   ;;  %v284_v26 = vpop.f32.mrf.mxu1 }
 0x197   :  { %318 = dma.done.wait [#allocation4], 128  }
 0x198   :  { %319 = vsyncadd [#allocation4], 4294967168 }
 0x199   :  { %231 = vsyncpa [#allocation4], 1 }

</bundles_post_ra>
